<compile_context>
chip_gen: v7x
topology: tpu7x:2x2x1
jax: 0.10.0
libtpu: 0.0.40
codegen_flags: <defaults>
</compile_context>

<pallas_src>
import jax
import jax.numpy as jnp
from jax.experimental import pallas as pl
from jax.experimental.pallas import tpu as pltpu

BN_EPS = 1e-5
NEG_FILL = -1e30  # bias for padded logit columns; exp() underflows to 0
LANE = 128


def _round_up(n, m):
    return ((n + m - 1) // m) * m


def _mlp_kernel(x_ref, w1_ref, p1_ref, w2_ref, p2_ref, w3_ref, b3_ref, o_ref):
    x = x_ref[...]  # f32 [B, d_in]

    # ---- fc1 (bf16 operands on the MXU, f32 accumulate) + ReLU -------------
    p1 = p1_ref[...]                       # (3, d_hid): [bias; gamma; beta]
    b1, g1, be1 = p1[0:1, :], p1[1:2, :], p1[2:3, :]
    h = jnp.dot(x.astype(jnp.bfloat16), w1_ref[...],
                preferred_element_type=jnp.float32) + b1
    h = jnp.maximum(h, 0.0)

    # ---- BatchNorm1d #1: training-mode batch stats, single pass ------------
    # var = E[h^2] - mu^2 (biased), folded scale = gamma * rsqrt(var + eps)
    mu = jnp.mean(h, axis=0, keepdims=True)
    var = jnp.maximum(jnp.mean(h * h, axis=0, keepdims=True) - mu * mu, 0.0)
    scale = g1 * jax.lax.rsqrt(var + BN_EPS)
    h = h * scale + (be1 - mu * scale)

    # ---- fc2 + ReLU ---------------------------------------------------------
    p2 = p2_ref[...]
    b2, g2, be2 = p2[0:1, :], p2[1:2, :], p2[2:3, :]
    h = jnp.dot(h.astype(jnp.bfloat16), w2_ref[...],
                preferred_element_type=jnp.float32) + b2
    h = jnp.maximum(h, 0.0)

    # ---- BatchNorm1d #2 -----------------------------------------------------
    mu = jnp.mean(h, axis=0, keepdims=True)
    var = jnp.maximum(jnp.mean(h * h, axis=0, keepdims=True) - mu * mu, 0.0)
    scale = g2 * jax.lax.rsqrt(var + BN_EPS)
    h = h * scale + (be2 - mu * scale)

    # ---- fc3 + LogSoftmax(dim=1) over the lane-padded logits ---------------
    # Padded columns carry bias = -1e30 -> exp() == 0, max unaffected.
    logits = jnp.dot(h.astype(jnp.bfloat16), w3_ref[...],
                     preferred_element_type=jnp.float32) + b3_ref[...]
    m = jnp.max(logits, axis=1, keepdims=True)
    lse = jnp.log(jnp.sum(jnp.exp(logits - m), axis=1, keepdims=True)) + m
    o_ref[...] = logits - lse


def init_params(key, d_in, d_hid, d_out):
    """Natural-layout f32 params (Linear weights pre-transposed to [in, out])."""
    ks = jax.random.split(key, 6)
    w1 = jax.random.normal(ks[0], (d_in, d_hid), jnp.float32) * 0.1
    b1 = jax.random.normal(ks[1], (1, d_hid), jnp.float32) * 0.1
    w2 = jax.random.normal(ks[2], (d_hid, d_hid), jnp.float32) * 0.1
    b2 = jax.random.normal(ks[3], (1, d_hid), jnp.float32) * 0.1
    w3 = jax.random.normal(ks[4], (d_hid, d_out), jnp.float32) * 0.1
    b3 = jax.random.normal(ks[5], (1, d_out), jnp.float32) * 0.1
    # BatchNorm affine params at PyTorch init (gamma=1, beta=0).
    g1 = jnp.ones((1, d_hid), jnp.float32)
    be1 = jnp.zeros((1, d_hid), jnp.float32)
    g2 = jnp.ones((1, d_hid), jnp.float32)
    be2 = jnp.zeros((1, d_hid), jnp.float32)
    return (w1, b1, g1, be1, w2, b2, g2, be2, w3, b3)


def pack_params(params):
    """One-time kernel-layout packing: bf16 weights, coalesced BN vectors,
    lane-padded fc3. Call once; reuse across forward calls."""
    w1, b1, g1, be1, w2, b2, g2, be2, w3, b3 = params
    d_out = w3.shape[1]
    d_out_pad = max(_round_up(d_out, LANE), LANE)

    w1p = w1.astype(jnp.bfloat16)
    w2p = w2.astype(jnp.bfloat16)
    w3p = jnp.zeros((w3.shape[0], d_out_pad), jnp.bfloat16)
    w3p = w3p.at[:, :d_out].set(w3.astype(jnp.bfloat16))
    b3p = jnp.full((1, d_out_pad), NEG_FILL, jnp.float32)
    b3p = b3p.at[:, :d_out].set(b3)

    p1 = jnp.concatenate([b1, g1, be1], axis=0)  # (3, d_hid) f32
    p2 = jnp.concatenate([b2, g2, be2], axis=0)  # (3, d_hid) f32
    return (w1p, p1, w2p, p2, w3p, b3p)


def net_forward(x, packed_params, d_out):
    """Forward pass of Net (relu / logsoftmax / use_bn=True)."""
    w1, p1, w2, p2, w3, b3 = packed_params
    B, d_in = x.shape
    d_hid = w1.shape[1]
    d_out_pad = w3.shape[1]

    def full(shape):
        return pl.BlockSpec(shape, lambda i, _s=shape: tuple(0 for _ in _s))

    out_pad = pl.pallas_call(
        _mlp_kernel,
        out_shape=jax.ShapeDtypeStruct((B, d_out_pad), jnp.float32),
        grid=(1,),
        in_specs=[
            full((B, d_in)),
            full((d_in, d_hid)), full((3, d_hid)),
            full((d_hid, d_hid)), full((3, d_hid)),
            full((d_hid, d_out_pad)), full((1, d_out_pad)),
        ],
        out_specs=full((B, d_out_pad)),
        compiler_params=pltpu.CompilerParams(
            dimension_semantics=("arbitrary",),
            vmem_limit_bytes=32 * 1024 * 1024,
        ),
    )(x, w1, p1, w2, p2, w3, b3)
    return out_pad[:, :d_out]


def reference_forward(x, params):
    """Pure-JAX reference mirroring the kernel's numerics (bf16 matmul, f32 BN)."""
    w1, b1, g1, be1, w2, b2, g2, be2, w3, b3 = params

    def bn(h, g, be):
        mu = jnp.mean(h, axis=0, keepdims=True)
        var = jnp.mean((h - mu) ** 2, axis=0, keepdims=True)
        return (h - mu) * jax.lax.rsqrt(var + BN_EPS) * g + be

    h = jnp.dot(x.astype(jnp.bfloat16), w1.astype(jnp.bfloat16),
                preferred_element_type=jnp.float32) + b1
    h = bn(jnp.maximum(h, 0.0), g1, be1)
    h = jnp.dot(h.astype(jnp.bfloat16), w2.astype(jnp.bfloat16),
                preferred_element_type=jnp.float32) + b2
    h = bn(jnp.maximum(h, 0.0), g2, be2)
    logits = jnp.dot(h.astype(jnp.bfloat16), w3.astype(jnp.bfloat16),
                     preferred_element_type=jnp.float32) + b3
    return jax.nn.log_softmax(logits, axis=1)


if __name__ == "__main__":
    key = jax.random.PRNGKey(0)
    B, d_in, d_hid, d_out = 8, 16, 32, 8

    kx, kp = jax.random.split(key)
    x = jax.random.normal(kx, (B, d_in), jnp.float32)
    params = init_params(kp, d_in, d_hid, d_out)
    packed = pack_params(params)  # one-time layout packing

    out = net_forward(x, packed, d_out)
    jax.block_until_ready(out)

    # Correctness checks: log-softmax rows sum to 1, and match pure-JAX ref.
    ref = reference_forward(x, params)
    row_sums = jnp.sum(jnp.exp(out), axis=1)
    assert out.shape == (B, d_out)
    assert bool(jnp.all(jnp.abs(row_sums - 1.0) < 1e-4))
    assert bool(jnp.all(jnp.abs(out - ref) < 2e-2))

    print("KERNEL_OK")
</pallas_src>

<mosaic_0001>
module attributes {stable_mosaic.version = 11 : i64} {
  func.func @_mlp_kernel(%arg0: i32, %arg1: memref<8x16xf32, #tpu.memory_space<vmem>>, %arg2: memref<16x32xbf16, #tpu.memory_space<vmem>>, %arg3: memref<3x32xf32, #tpu.memory_space<vmem>>, %arg4: memref<32x32xbf16, #tpu.memory_space<vmem>>, %arg5: memref<3x32xf32, #tpu.memory_space<vmem>>, %arg6: memref<32x128xbf16, #tpu.memory_space<vmem>>, %arg7: memref<1x128xf32, #tpu.memory_space<vmem>>, %arg8: memref<8x128xf32, #tpu.memory_space<vmem>>) attributes {dimension_semantics = [#tpu.dimension_semantics<arbitrary>], iteration_bounds = array<i64: 1>, scalar_prefetch = 0 : i64, scratch_operands = 0 : i64, tpu.core_type = #tpu.core_type<tc>, window_params = [{pipeline_mode = #tpu.pipeline_mode<synchronous>, transform_indices = @transform_0, window_bounds = array<i64: 8, 16>}, {pipeline_mode = #tpu.pipeline_mode<synchronous>, transform_indices = @transform_1, window_bounds = array<i64: 16, 32>}, {pipeline_mode = #tpu.pipeline_mode<synchronous>, transform_indices = @transform_2, window_bounds = array<i64: 3, 32>}, {pipeline_mode = #tpu.pipeline_mode<synchronous>, transform_indices = @transform_3, window_bounds = array<i64: 32, 32>}, {pipeline_mode = #tpu.pipeline_mode<synchronous>, transform_indices = @transform_4, window_bounds = array<i64: 3, 32>}, {pipeline_mode = #tpu.pipeline_mode<synchronous>, transform_indices = @transform_5, window_bounds = array<i64: 32, 128>}, {pipeline_mode = #tpu.pipeline_mode<synchronous>, transform_indices = @transform_6, window_bounds = array<i64: 1, 128>}, {pipeline_mode = #tpu.pipeline_mode<synchronous>, transform_indices = @transform_7, window_bounds = array<i64: 8, 128>}]} {
    %c0 = arith.constant 0 : index
    %c0_0 = arith.constant 0 : index
    %0 = vector.load %arg1[%c0, %c0_0] : memref<8x16xf32, #tpu.memory_space<vmem>>, vector<8x16xf32>
    %c0_1 = arith.constant 0 : index
    %c0_2 = arith.constant 0 : index
    %1 = vector.load %arg3[%c0_1, %c0_2] : memref<3x32xf32, #tpu.memory_space<vmem>>, vector<3x32xf32>
    %2 = vector.extract_strided_slice %1 {offsets = [0, 0], sizes = [1, 32], strides = [1, 1]} : vector<3x32xf32> to vector<1x32xf32>
    %3 = vector.extract_strided_slice %1 {offsets = [1, 0], sizes = [1, 32], strides = [1, 1]} : vector<3x32xf32> to vector<1x32xf32>
    %4 = vector.extract_strided_slice %1 {offsets = [2, 0], sizes = [1, 32], strides = [1, 1]} : vector<3x32xf32> to vector<1x32xf32>
    %5 = arith.truncf %0 : vector<8x16xf32> to vector<8x16xbf16>
    %c0_3 = arith.constant 0 : index
    %c0_4 = arith.constant 0 : index
    %6 = vector.load %arg2[%c0_3, %c0_4] : memref<16x32xbf16, #tpu.memory_space<vmem>>, vector<16x32xbf16>
    %cst = arith.constant dense<0.000000e+00> : vector<8x32xf32>
    %7 = tpu.matmul %5, %6, %cst {dimension_numbers = #tpu.dot_dimension_numbers<[1], [0], [0], [1], [0, 0, 1, 1], [], []>} : vector<8x16xbf16>, vector<16x32xbf16>, vector<8x32xf32> -> vector<8x32xf32>
    %8 = vector.broadcast %2 : vector<1x32xf32> to vector<8x32xf32>
    %9 = arith.addf %7, %8 : vector<8x32xf32>
    %cst_5 = arith.constant 0.000000e+00 : f32
    %10 = vector.broadcast %cst_5 : f32 to vector<8x32xf32>
    %11 = arith.maximumf %9, %10 : vector<8x32xf32>
    %cst_6 = arith.constant dense<0.000000e+00> : vector<32xf32>
    %12 = vector.multi_reduction <add>, %11, %cst_6 [0] : vector<8x32xf32> to vector<32xf32>
    %13 = vector.shape_cast %12 : vector<32xf32> to vector<1x32xf32>
    %cst_7 = arith.constant 8.000000e+00 : f32
    %14 = vector.broadcast %cst_7 : f32 to vector<1x32xf32>
    %15 = arith.divf %13, %14 : vector<1x32xf32>
    %16 = arith.mulf %11, %11 : vector<8x32xf32>
    %cst_8 = arith.constant dense<0.000000e+00> : vector<32xf32>
    %17 = vector.multi_reduction <add>, %16, %cst_8 [0] : vector<8x32xf32> to vector<32xf32>
    %18 = vector.shape_cast %17 : vector<32xf32> to vector<1x32xf32>
    %cst_9 = arith.constant 8.000000e+00 : f32
    %19 = vector.broadcast %cst_9 : f32 to vector<1x32xf32>
    %20 = arith.divf %18, %19 : vector<1x32xf32>
    %21 = arith.mulf %15, %15 : vector<1x32xf32>
    %22 = arith.subf %20, %21 : vector<1x32xf32>
    %cst_10 = arith.constant 0.000000e+00 : f32
    %23 = vector.broadcast %cst_10 : f32 to vector<1x32xf32>
    %24 = arith.maximumf %22, %23 : vector<1x32xf32>
    %cst_11 = arith.constant 9.99999974E-6 : f32
    %25 = vector.broadcast %cst_11 : f32 to vector<1x32xf32>
    %26 = arith.addf %24, %25 : vector<1x32xf32>
    %27 = math.rsqrt %26 : vector<1x32xf32>
    %28 = arith.mulf %3, %27 : vector<1x32xf32>
    %29 = vector.broadcast %28 : vector<1x32xf32> to vector<8x32xf32>
    %30 = arith.mulf %11, %29 : vector<8x32xf32>
    %31 = arith.mulf %15, %28 : vector<1x32xf32>
    %32 = arith.subf %4, %31 : vector<1x32xf32>
    %33 = vector.broadcast %32 : vector<1x32xf32> to vector<8x32xf32>
    %34 = arith.addf %30, %33 : vector<8x32xf32>
    %c0_12 = arith.constant 0 : index
    %c0_13 = arith.constant 0 : index
    %35 = vector.load %arg5[%c0_12, %c0_13] : memref<3x32xf32, #tpu.memory_space<vmem>>, vector<3x32xf32>
    %36 = vector.extract_strided_slice %35 {offsets = [0, 0], sizes = [1, 32], strides = [1, 1]} : vector<3x32xf32> to vector<1x32xf32>
    %37 = vector.extract_strided_slice %35 {offsets = [1, 0], sizes = [1, 32], strides = [1, 1]} : vector<3x32xf32> to vector<1x32xf32>
    %38 = vector.extract_strided_slice %35 {offsets = [2, 0], sizes = [1, 32], strides = [1, 1]} : vector<3x32xf32> to vector<1x32xf32>
    %39 = arith.truncf %34 : vector<8x32xf32> to vector<8x32xbf16>
    %c0_14 = arith.constant 0 : index
    %c0_15 = arith.constant 0 : index
    %40 = vector.load %arg4[%c0_14, %c0_15] : memref<32x32xbf16, #tpu.memory_space<vmem>>, vector<32x32xbf16>
    %cst_16 = arith.constant dense<0.000000e+00> : vector<8x32xf32>
    %41 = tpu.matmul %39, %40, %cst_16 {dimension_numbers = #tpu.dot_dimension_numbers<[1], [0], [0], [1], [0, 0, 1, 1], [], []>} : vector<8x32xbf16>, vector<32x32xbf16>, vector<8x32xf32> -> vector<8x32xf32>
    %42 = vector.broadcast %36 : vector<1x32xf32> to vector<8x32xf32>
    %43 = arith.addf %41, %42 : vector<8x32xf32>
    %cst_17 = arith.constant 0.000000e+00 : f32
    %44 = vector.broadcast %cst_17 : f32 to vector<8x32xf32>
    %45 = arith.maximumf %43, %44 : vector<8x32xf32>
    %cst_18 = arith.constant dense<0.000000e+00> : vector<32xf32>
    %46 = vector.multi_reduction <add>, %45, %cst_18 [0] : vector<8x32xf32> to vector<32xf32>
    %47 = vector.shape_cast %46 : vector<32xf32> to vector<1x32xf32>
    %cst_19 = arith.constant 8.000000e+00 : f32
    %48 = vector.broadcast %cst_19 : f32 to vector<1x32xf32>
    %49 = arith.divf %47, %48 : vector<1x32xf32>
    %50 = arith.mulf %45, %45 : vector<8x32xf32>
    %cst_20 = arith.constant dense<0.000000e+00> : vector<32xf32>
    %51 = vector.multi_reduction <add>, %50, %cst_20 [0] : vector<8x32xf32> to vector<32xf32>
    %52 = vector.shape_cast %51 : vector<32xf32> to vector<1x32xf32>
    %cst_21 = arith.constant 8.000000e+00 : f32
    %53 = vector.broadcast %cst_21 : f32 to vector<1x32xf32>
    %54 = arith.divf %52, %53 : vector<1x32xf32>
    %55 = arith.mulf %49, %49 : vector<1x32xf32>
    %56 = arith.subf %54, %55 : vector<1x32xf32>
    %cst_22 = arith.constant 0.000000e+00 : f32
    %57 = vector.broadcast %cst_22 : f32 to vector<1x32xf32>
    %58 = arith.maximumf %56, %57 : vector<1x32xf32>
    %cst_23 = arith.constant 9.99999974E-6 : f32
    %59 = vector.broadcast %cst_23 : f32 to vector<1x32xf32>
    %60 = arith.addf %58, %59 : vector<1x32xf32>
    %61 = math.rsqrt %60 : vector<1x32xf32>
    %62 = arith.mulf %37, %61 : vector<1x32xf32>
    %63 = vector.broadcast %62 : vector<1x32xf32> to vector<8x32xf32>
    %64 = arith.mulf %45, %63 : vector<8x32xf32>
    %65 = arith.mulf %49, %62 : vector<1x32xf32>
    %66 = arith.subf %38, %65 : vector<1x32xf32>
    %67 = vector.broadcast %66 : vector<1x32xf32> to vector<8x32xf32>
    %68 = arith.addf %64, %67 : vector<8x32xf32>
    %69 = arith.truncf %68 : vector<8x32xf32> to vector<8x32xbf16>
    %c0_24 = arith.constant 0 : index
    %c0_25 = arith.constant 0 : index
    %70 = vector.load %arg6[%c0_24, %c0_25] : memref<32x128xbf16, #tpu.memory_space<vmem>>, vector<32x128xbf16>
    %cst_26 = arith.constant dense<0.000000e+00> : vector<8x128xf32>
    %71 = tpu.matmul %69, %70, %cst_26 {dimension_numbers = #tpu.dot_dimension_numbers<[1], [0], [0], [1], [0, 0, 1, 1], [], []>} : vector<8x32xbf16>, vector<32x128xbf16>, vector<8x128xf32> -> vector<8x128xf32>
    %c0_27 = arith.constant 0 : index
    %c0_28 = arith.constant 0 : index
    %72 = vector.load %arg7[%c0_27, %c0_28] : memref<1x128xf32, #tpu.memory_space<vmem>>, vector<1x128xf32>
    %73 = vector.broadcast %72 : vector<1x128xf32> to vector<8x128xf32>
    %74 = arith.addf %71, %73 : vector<8x128xf32>
    %cst_29 = arith.constant dense<0xFF800000> : vector<8xf32>
    %75 = vector.multi_reduction <maximumf>, %74, %cst_29 [1] : vector<8x128xf32> to vector<8xf32>
    %76 = vector.shape_cast %75 : vector<8xf32> to vector<8x1xf32>
    %77 = vector.broadcast %76 : vector<8x1xf32> to vector<8x128xf32>
    %78 = arith.subf %74, %77 : vector<8x128xf32>
    %79 = math.exp %78 : vector<8x128xf32>
    %cst_30 = arith.constant dense<0.000000e+00> : vector<8xf32>
    %80 = vector.multi_reduction <add>, %79, %cst_30 [1] : vector<8x128xf32> to vector<8xf32>
    %81 = vector.shape_cast %80 : vector<8xf32> to vector<8x1xf32>
    %82 = math.log %81 : vector<8x1xf32>
    %83 = arith.addf %82, %76 : vector<8x1xf32>
    %84 = vector.broadcast %83 : vector<8x1xf32> to vector<8x128xf32>
    %85 = arith.subf %74, %84 : vector<8x128xf32>
    %c0_31 = arith.constant 0 : index
    %c0_32 = arith.constant 0 : index
    %86 = vector.load %arg8[%c0_31, %c0_32] : memref<8x128xf32, #tpu.memory_space<vmem>>, vector<8x128xf32>
    tpu.vector_store %arg8[%c0_31, %c0_32], %85 {strides = array<i32>} : memref<8x128xf32, #tpu.memory_space<vmem>>, vector<8x128xf32>,
    return
  }
  func.func @transform_0(%arg0: i32) -> (i32, i32) {
    %c0_i32 = arith.constant 0 : i32
    %c0_i32_0 = arith.constant 0 : i32
    %c0_i32_1 = arith.constant 0 : i32
    return %c0_i32, %c0_i32_0 : i32, i32
  }
  func.func @transform_1(%arg0: i32) -> (i32, i32) {
    %c0_i32 = arith.constant 0 : i32
    %c0_i32_0 = arith.constant 0 : i32
    %c0_i32_1 = arith.constant 0 : i32
    return %c0_i32, %c0_i32_0 : i32, i32
  }
  func.func @transform_2(%arg0: i32) -> (i32, i32) {
    %c0_i32 = arith.constant 0 : i32
    %c0_i32_0 = arith.constant 0 : i32
    %c0_i32_1 = arith.constant 0 : i32
    return %c0_i32, %c0_i32_0 : i32, i32
  }
  func.func @transform_3(%arg0: i32) -> (i32, i32) {
    %c0_i32 = arith.constant 0 : i32
    %c0_i32_0 = arith.constant 0 : i32
    %c0_i32_1 = arith.constant 0 : i32
    return %c0_i32, %c0_i32_0 : i32, i32
  }
  func.func @transform_4(%arg0: i32) -> (i32, i32) {
    %c0_i32 = arith.constant 0 : i32
    %c0_i32_0 = arith.constant 0 : i32
    %c0_i32_1 = arith.constant 0 : i32
    return %c0_i32, %c0_i32_0 : i32, i32
  }
  func.func @transform_5(%arg0: i32) -> (i32, i32) {
    %c0_i32 = arith.constant 0 : i32
    %c0_i32_0 = arith.constant 0 : i32
    %c0_i32_1 = arith.constant 0 : i32
    return %c0_i32, %c0_i32_0 : i32, i32
  }
  func.func @transform_6(%arg0: i32) -> (i32, i32) {
    %c0_i32 = arith.constant 0 : i32
    %c0_i32_0 = arith.constant 0 : i32
    %c0_i32_1 = arith.constant 0 : i32
    return %c0_i32, %c0_i32_0 : i32, i32
  }
  func.func @transform_7(%arg0: i32) -> (i32, i32) {
    %c0_i32 = arith.constant 0 : i32
    %c0_i32_0 = arith.constant 0 : i32
    %c0_i32_1 = arith.constant 0 : i32
    return %c0_i32, %c0_i32_0 : i32, i32
  }
}

</mosaic_0001>

<bundles_post_ra>
// kernel: tpu_custom_call.1
= control target key start
LH: loop header
LB: loop body
LE: loop exit
PB: predicated region body
PF: predicated region fallthrough
CT: control target
= control target key end

     0   :  { %12 = vsyncpa [#allocation3], 0  ;;  %s742_s0 = inlined_call_operand.hbm [shape: f32[8,16], index: 0, kind: input, shape index: {}]   ;;  %s743_s1 = inlined_call_operand.hbm [shape: bf16[16,32], index: 1, kind: input, shape index: {}]   ;;  %s744_s2 = inlined_call_operand.hbm [shape: f32[3,32], index: 2, kind: input, shape index: {}]   ;;  %s745_s3 = inlined_call_operand.hbm [shape: bf16[32,32], index: 3, kind: input, shape index: {}]   ;;  %s746_s4 = inlined_call_operand.hbm [shape: f32[3,32], index: 4, kind: input, shape index: {}]   ;;  %s747_s5 = inlined_call_operand.vmem [shape: bf16[32,128], index: 5, kind: input, shape index: {}]   ;;  %s748_s6 = inlined_call_operand.vmem [shape: f32[1,128], index: 6, kind: input, shape index: {}]   ;;  %s749_s7 = inlined_call_operand.hbm [shape: f32[8,128], index: 7, kind: output, shape index: {}]  }
   0x1   :  { %13 = vsyncpa [#allocation6], 0 }
   0x2   :  { %14 = vsyncpa [#allocation9], 0 }
   0x3   :  { %15 = vsyncpa [#allocation4], 0  ;;  %s592_s24 = smov [#allocation5]   ;;  %s452_s28 = scalar_lea.hbm %s743_s1, 128 }
   0x4   :  { %s31_s25 = sshll.u32 %s592_s24, 4  ;;  %p453_p0 = scmp.ne.s32.totalorder %s743_s1, %s452_s28  ;;  %s32_s25 = int_to_ptr.vmem [resolvable:$true] %s31_s25 }
   0x5   :  { %p456_p1 = scmp.lt.u32.totalorder %s452_s28, %s743_s1 }
   0x7   :  { %p458_p2 = pnand %p456_p1, %p453_p0 }
   0x9   :  { %461 = shalt.err (!%p458_p2)
}
   0xa   :  { %s462_s10 = scalar_lea.vmem %s32_s25, 128  ;;  %p467_p4 = scmp.lt.s32.totalorder %s32_s25, %s32_s25 }
   0xb   :  { %p463_p3 = scmp.ne.s32.totalorder %s32_s25, %s462_s10  ;;  %p468_p5 = scmp.lt.s32.totalorder %s462_s10, %s462_s10 }
   0xd   :  { %p469_p6 = por %p468_p5, %p467_p4 }
   0xf   :  { %p470_p7 = pnand %p469_p6, %p463_p3 }
  0x11   :  { %473 = shalt.err (!%p470_p7)
}
  0x12   :  { %s593_s11 = smov 64   ;;  %s594_s12 = smov 4  }
  0x13   :  { %37 = dma.hbm_to_vmem [thread:$0]  %s743_s1, 128, %s32_s25, [#allocation6], %s593_s11, %s593_s11, %s594_s12  }
  0x14   :  { %s595_s15 = smov [#allocation8]   ;;  %s596_s17 = smov [#allocation2]  }
  0x15   :  { %s53_s16 = sshll.u32 %s595_s15, 4  ;;  %s22_s18 = sshll.u32 %s596_s17, 4  ;;  %s54_s16 = int_to_ptr.vmem [resolvable:$true] %s53_s16  ;;  %s23_s18 = int_to_ptr.vmem [resolvable:$true] %s22_s18 }
  0x16   :  { %s474_s21 = scalar_lea.hbm %s745_s3, 256 }
  0x17   :  { %p475_p8 = scmp.ne.s32.totalorder %s745_s3, %s474_s21  ;;  %p478_p9 = scmp.lt.u32.totalorder %s474_s21, %s745_s3 }
  0x19   :  { %p480_p10 = pnand %p478_p9, %p475_p8 }
  0x1b   :  { %483 = shalt.err (!%p480_p10)
}
  0x1c   :  { %s484_s1 = scalar_lea.vmem %s54_s16, 256  ;;  %p489_p12 = scmp.lt.s32.totalorder %s54_s16, %s54_s16 }
  0x1d   :  { %p485_p11 = scmp.ne.s32.totalorder %s54_s16, %s484_s1  ;;  %p490_p13 = scmp.lt.s32.totalorder %s484_s1, %s484_s1 }
  0x1f   :  { %p491_p0 = por %p490_p13, %p489_p12 }
  0x21   :  { %p492_p1 = pnand %p491_p0, %p485_p11 }
  0x23   :  { %495 = shalt.err (!%p492_p1)
}
  0x24   :  { %59 = dma.hbm_to_vmem [thread:$0]  %s745_s3, 256, %s54_s16, [#allocation9], %s593_s11, %s593_s11, %s594_s12  }
  0x25   :  { %s496_s30 = scalar_lea.hbm %s742_s0, 128 }
  0x26   :  { %p497_p2 = scmp.ne.s32.totalorder %s742_s0, %s496_s30  ;;  %p500_p3 = scmp.lt.u32.totalorder %s496_s30, %s742_s0 }
  0x28   :  { %p502_p4 = pnand %p500_p3, %p497_p2 }
  0x2a   :  { %505 = shalt.err (!%p502_p4)
}
  0x2b   :  { %s506_s14 = scalar_lea.vmem %s23_s18, 128  ;;  %p511_p6 = scmp.lt.s32.totalorder %s23_s18, %s23_s18 }
  0x2c   :  { %p507_p5 = scmp.ne.s32.totalorder %s23_s18, %s506_s14  ;;  %p512_p7 = scmp.lt.s32.totalorder %s506_s14, %s506_s14 }
  0x2e   :  { %p513_p8 = por %p512_p7, %p511_p6 }
  0x30   :  { %p514_p9 = pnand %p513_p8, %p507_p5 }
  0x32   :  { %517 = shalt.err (!%p514_p9)
}
  0x33   :  { %25 = dma.hbm_to_vmem [thread:$0]  %s742_s0, 128, %s23_s18, [#allocation3]  }
  0x34   :  { %s597_s12 = smov [#allocation7]   ;;  %s598_s16 = smov [#allocation10]  }
  0x35   :  { %s44_s15 = sshll.u32 %s597_s12, 4  ;;  %s66_s17 = sshll.u32 %s598_s16, 4  ;;  %s45_s15 = int_to_ptr.vmem [resolvable:$true] %s44_s15  ;;  %s67_s17 = int_to_ptr.vmem [resolvable:$true] %s66_s17 }
  0x36   :  { %s518_s21 = scalar_lea.hbm %s744_s2, 64 }
  0x37   :  { %p519_p10 = scmp.ne.s32.totalorder %s744_s2, %s518_s21  ;;  %p522_p11 = scmp.lt.u32.totalorder %s518_s21, %s744_s2 }
  0x39   :  { %p524_p12 = pnand %p522_p11, %p519_p10 }
  0x3b   :  { %527 = shalt.err (!%p524_p12)
}
  0x3c   :  { %s528_s0 = scalar_lea.vmem %s45_s15, 64  ;;  %p533_p0 = scmp.lt.s32.totalorder %s45_s15, %s45_s15 }
  0x3d   :  { %p529_p13 = scmp.ne.s32.totalorder %s45_s15, %s528_s0  ;;  %p534_p1 = scmp.lt.s32.totalorder %s528_s0, %s528_s0 }
  0x3f   :  { %p535_p2 = por %p534_p1, %p533_p0 }
  0x41   :  { %p536_p3 = pnand %p535_p2, %p529_p13 }
  0x43   :  { %539 = shalt.err (!%p536_p3)
}
  0x44   :  { %47 = dma.hbm_to_vmem [thread:$0]  %s744_s2, 64, %s45_s15, [#allocation6]  }
  0x45   :  { %s540_s28 = scalar_lea.hbm %s746_s4, 64 }
  0x46   :  { %p541_p4 = scmp.ne.s32.totalorder %s746_s4, %s540_s28  ;;  %p544_p5 = scmp.lt.u32.totalorder %s540_s28, %s746_s4 }
  0x48   :  { %p546_p6 = pnand %p544_p5, %p541_p4 }
  0x4a   :  { %549 = shalt.err (!%p546_p6)
}
  0x4b   :  { %s550_s10 = scalar_lea.vmem %s67_s17, 64  ;;  %p555_p8 = scmp.lt.s32.totalorder %s67_s17, %s67_s17 }
  0x4c   :  { %p551_p7 = scmp.ne.s32.totalorder %s67_s17, %s550_s10  ;;  %p556_p9 = scmp.lt.s32.totalorder %s550_s10, %s550_s10 }
  0x4e   :  { %p557_p10 = por %p556_p9, %p555_p8 }
  0x50   :  { %p558_p11 = pnand %p557_p10, %p551_p7 }
  0x52   :  { %561 = shalt.err (!%p558_p11)
}
  0x53   :  { %69 = dma.hbm_to_vmem [thread:$0]  %s746_s4, 64, %s67_s17, [#allocation9]  }
  0x54   :  { %584 = dma.done.wait [#allocation3], 128  }
  0x55   :  { %585 = vsyncadd [#allocation3], 4294967168 }
  0x56   :  { %586 = dma.done.wait [#allocation6], 192  }
  0x57   :  { %587 = vsyncadd [#allocation6], 4294967104 }
  0x58   :  { %588 = dma.done.wait [#allocation9], 320  }
  0x59   :  { %589 = vsyncadd [#allocation9], 4294966976  ;;  %v599_v0 = vmov 0.0   ;;  %vm600_vm0 = vmmov 0   ;;  %v439_v1 = vld [vmem:[#allocation5] sm:$0xff]   ;;  %v90_v2 = vld [vmem:[#allocation2] sm:$0xff]  ;;  %v95_v6 = vlaneseq }
  0x5a   :  { %407 = vmatprep.subr.bf16.mxu0 %v599_v0  ;;  %409 = vmatprep.mubr.msk.bf16.mxu0 %vm600_vm0, %v599_v0  ;;  %vm105_vm1 = vcmask 130048   ;;  %v92_v3 = vpack.c.bf16 %v90_v2, %v90_v2  ;;  %v440_v4 = vld [vmem:[#allocation8] sm:$0xff]   ;;  %v441_v5 = vld [vmem:[#allocation8 + $0x8] sm:$0xff]   ;;  %v91_v9 = vld [vmem:[#allocation7] sm:$0x7]  ;;  %vm150_vm2 = vcmask 261120  }
  0x5b   :  { %413 = vmatprep.subr.bf16.mxu1 %v599_v0  ;;  %417 = vmatprep.mubr.msk.bf16.mxu1 %vm600_vm0, %v599_v0  ;;  %v709_v7 = vshrl.u32 %v95_v6, 7  ;;  %v442_v50 = vld [vmem:[%s747_s5] sm:$0xff]   ;;  %v443_v51 = vld [vmem:[%s747_s5 + $0x8] sm:$0xff]   ;;  %v190_v52 = vld [vmem:[#allocation10] sm:$0x7]  ;;  %s601_s15 = smov [#allocation11]  }
  0x5c   :  { %408 = vmatpush3.bf16.msra.mxu0 %v439_v1  ;;  %414 = vmatpush3.bf16.msra.mxu1 %v440_v4  ;;  %s379_s16 = sshll.u32 %s601_s15, 4  ;;  %s380_s16 = int_to_ptr.vmem [resolvable:$true] %s379_s16 }
  0x5d   :  { %421 = vmatprep.subr.bf16.mxu0 %v599_v0  ;;  %415 = vmatprep.subr.bf16.mxu1 %v599_v0  ;;  %v97_v8 = vsub.s32 0, %v709_v7  ;;  %v177_v40 = vsub.s32 1, %v709_v7  ;;  %v187_v44 = vsub.s32 2, %v709_v7  ;;  %p567_p13 = scmp.lt.s32.totalorder %s380_s16, %s380_s16 }
  0x5f   :  { %410 = vmatmul.mubr.msk.bf16.vlgmr.msra.gmra.mrb[0].mxu0 %vm105_vm1, %v92_v3  ;;  %v98_v10 = vrot.slane %v91_v9, %v97_v8  ;;  %v199_v53 = vrot.slane %v190_v52, %v97_v8 }
  0x60   :  { %425 = vmatprep.mubr.msk.bf16.mxu0 %vm600_vm0, %v599_v0  ;;  %416 = vmatpush3.bf16.msra.mxu1 %v441_v5 }
  0x61   :  { %422 = vmatpush3.bf16.msra.mxu0 %v442_v50 }
  0x62   :  { %423 = vmatprep.subr.bf16.mxu0 %v599_v0 }
  0x65   :  { %424 = vmatpush3.bf16.msra.mxu0 %v443_v51 }
 0x132   :  { %v143_v11 = vpop.f32.mrb[0].mxu0 }
 0x133   :  { %v144_v12 = vadd.f32 %v143_v11, %v98_v10  ;;  %v411_v13 = vpop.f32.mrb[1].mxu0 }
 0x134   :  { %v146_v14 = vpop.f32.mrb[2].mxu0 }
 0x135   :  { %v149_v15 = vmax.f32 %v144_v12, 0.0  ;;  %v412_v16 = vpop.f32.mrb[3].mxu0 }
 0x137   :  { %v151_v17 = vsel %vm150_vm2, %v149_v15, 0.0  ;;  %v160_v18 = vmul.f32 %v149_v15, %v149_v15 }
 0x138   :  { %v152_v19 = vrot.slane %v151_v17, 4 }
 0x139   :  { %v161_v20 = vsel %vm150_vm2, %v160_v18, 0.0 }
 0x13a   :  { %v153_v21 = vadd.f32 %v152_v19, %v151_v17  ;;  %v162_v22 = vrot.slane %v161_v20, 4 }
 0x13c   :  { %v154_v23 = vrot.slane %v153_v21, 2  ;;  %v163_v24 = vadd.f32 %v162_v22, %v161_v20 }
 0x13e   :  { %v155_v25 = vadd.f32 %v154_v23, %v153_v21  ;;  %v164_v26 = vrot.slane %v163_v24, 2 }
 0x140   :  { %v156_v27 = vrot.slane %v155_v25, 1  ;;  %v165_v28 = vadd.f32 %v164_v26, %v163_v24 }
 0x142   :  { %v157_v29 = vadd.f32 %v156_v27, %v155_v25  ;;  %v166_v30 = vrot.slane %v165_v28, 1  ;;  %v395_v27 = vld [vmem:[%s748_s6] ss:$0 sm:$0xff]  ;;  %s562_s6 = scalar_lea.vmem %s380_s16, 128 }
 0x143   :  { %p563_p12 = scmp.ne.s32.totalorder %s380_s16, %s562_s6  ;;  %p568_p0 = scmp.lt.s32.totalorder %s562_s6, %s562_s6 }
 0x144   :  { %v159_v31 = vmul.f32 0.125, %v157_v29  ;;  %v167_v32 = vadd.f32 %v166_v30, %v165_v28 }
 0x145   :  { %p569_p1 = por %p568_p0, %p567_p13 }
 0x146   :  { %v168_v33 = vmul.f32 0.125, %v167_v32  ;;  %v169_v34 = vmul.f32 %v159_v31, %v159_v31 }
 0x147   :  { %p570_p2 = pnand %p569_p1, %p563_p12 }
 0x148   :  { %v170_v35 = vsub.f32 %v168_v33, %v169_v34 }
 0x14a   :  { %v171_v36 = vmax.f32 %v170_v35, 0.0 }
 0x14c   :  { %v172_v37 = vadd.f32 1e-05, %v171_v36 }
 0x14e   :  { %444 = vrsqrt.f32 %v172_v37 }
 0x158   :  { %v445_v38 = vpop.eup %444 }
 0x159   :  { %v174_v39 = vmul.f32 %v445_v38, %v91_v9 }
 0x15b   :  { %v180_v41 = vmul.f32 %v174_v39, %v159_v31  ;;  %v178_v42 = vrot.slane %v174_v39, %v177_v40 }
 0x15d   :  { %v182_v43 = vrot.slane %v180_v41, 7  ;;  %v179_v46 = vmul.f32 %v178_v42, %v149_v15 }
 0x15f   :  { %v184_v45 = vsub.f32 %v91_v9, %v182_v43 }
 0x161   :  { %v188_v47 = vrot.slane %v184_v45, %v187_v44 }
 0x163   :  { %v189_v48 = vadd.f32 %v188_v47, %v179_v46 }
 0x165   :  { %v191_v49 = vpack.c.bf16 %v189_v48, %v189_v48 }
 0x167   :  { %418 = vmatmul.mubr.msk.bf16.vlgmr.msra.gmra.mrb[0].mxu1 %vm150_vm2, %v191_v49 }
 0x23a   :  { %v249_v54 = vpop.f32.mrb[0].mxu1 }
 0x23b   :  { %v250_v55 = vadd.f32 %v249_v54, %v199_v53  ;;  %v419_v56 = vpop.f32.mrb[1].mxu1 }
 0x23c   :  { %v252_v57 = vpop.f32.mrb[2].mxu1 }
 0x23d   :  { %v255_v58 = vmax.f32 %v250_v55, 0.0  ;;  %v420_v59 = vpop.f32.mrb[3].mxu1 }
 0x23f   :  { %v256_v60 = vsel %vm150_vm2, %v255_v58, 0.0  ;;  %v264_v61 = vmul.f32 %v255_v58, %v255_v58 }
 0x240   :  { %v257_v62 = vrot.slane %v256_v60, 4 }
 0x241   :  { %v265_v63 = vsel %vm150_vm2, %v264_v61, 0.0 }
 0x242   :  { %v258_v0 = vadd.f32 %v257_v62, %v256_v60  ;;  %v266_v1 = vrot.slane %v265_v63, 4 }
 0x244   :  { %v259_v2 = vrot.slane %v258_v0, 2  ;;  %v267_v3 = vadd.f32 %v266_v1, %v265_v63 }
 0x246   :  { %v260_v4 = vadd.f32 %v259_v2, %v258_v0  ;;  %v268_v5 = vrot.slane %v267_v3, 2 }
 0x248   :  { %v261_v6 = vrot.slane %v260_v4, 1  ;;  %v269_v7 = vadd.f32 %v268_v5, %v267_v3 }
 0x24a   :  { %v262_v8 = vadd.f32 %v261_v6, %v260_v4  ;;  %v270_v9 = vrot.slane %v269_v7, 1 }
 0x24c   :  { %v263_v10 = vmul.f32 0.125, %v262_v8  ;;  %v271_v11 = vadd.f32 %v270_v9, %v269_v7 }
 0x24e   :  { %v272_v12 = vmul.f32 0.125, %v271_v11  ;;  %v273_v13 = vmul.f32 %v263_v10, %v263_v10 }
 0x250   :  { %v274_v14 = vsub.f32 %v272_v12, %v273_v13 }
 0x252   :  { %v275_v15 = vmax.f32 %v274_v14, 0.0 }
 0x254   :  { %v276_v16 = vadd.f32 1e-05, %v275_v15 }
 0x256   :  { %446 = vrsqrt.f32 %v276_v16 }
 0x260   :  { %v447_v17 = vpop.eup %446 }
 0x261   :  { %v278_v18 = vmul.f32 %v447_v17, %v190_v52 }
 0x263   :  { %v284_v19 = vmul.f32 %v278_v18, %v263_v10  ;;  %v282_v20 = vrot.slane %v278_v18, %v177_v40 }
 0x265   :  { %v286_v21 = vrot.slane %v284_v19, 7  ;;  %v283_v23 = vmul.f32 %v282_v20, %v255_v58 }
 0x267   :  { %v288_v22 = vsub.f32 %v190_v52, %v286_v21 }
 0x269   :  { %v292_v24 = vrot.slane %v288_v22, %v187_v44 }
 0x26b   :  { %v293_v25 = vadd.f32 %v292_v24, %v283_v23 }
 0x26d   :  { %v294_v26 = vpack.c.bf16 %v293_v25, %v293_v25 }
 0x26f   :  { %426 = vmatmul.mubr.msk.bf16.vlgmr.msra.gmra.mrb[4].mxu0 %vm150_vm2, %v294_v26 }
 0x342   :  { %v355_v28 = vpop.f32.mrb[4].mxu0 }
 0x343   :  { %v356_v29 = vadd.f32 %v395_v27, %v355_v28  ;;  %v427_v30 = vpop.f32.mrb[5].mxu0 }
 0x344   :  { %v358_v31 = vpop.f32.mrb[6].mxu0 }
 0x345   :  { %361 = vmax.xlane.f32.xlu0 %v356_v29  ;;  %v428_v32 = vpop.f32.mrb[7].mxu0 }
 0x3d2   :  { %v362_v33 = vpop.xlane.xlu0 %361 }
 0x3d3   :  { %v363_v34 = vsub.f32 %v356_v29, %v362_v33 }
 0x3d5   :  { %v364_v35 = vmul.f32 1.442695, %v363_v34 }
 0x3d7   :  { %448 = vpow2.f32 %v364_v35 }
 0x3e1   :  { %v449_v36 = vpop.eup %448 }
 0x3e2   :  { %366 = vadd.xlane.f32.xlu0 %v449_v36 }
 0x46f   :  { %v367_v37 = vpop.xlane.xlu0 %366 }
 0x470   :  { %450 = vlog2.f32 %v367_v37 }
 0x47a   :  { %v451_v38 = vpop.eup %450 }
 0x47b   :  { %v369_v39 = vmul.f32 0.6931472, %v451_v38 }
 0x47d   :  { %v370_v40 = vadd.f32 %v369_v39, %v362_v33 }
 0x47f   :  { %v371_v41 = vsub.f32 %v356_v29, %v370_v40 }
 0x481   :  { %372 = vst [vmem:[#allocation11] sm:$0xff] %v371_v41 }
 0x482   :  { %573 = shalt.err (!%p570_p2)
}
 0x483   :  { %s574_s20 = scalar_lea.hbm %s749_s7, 128 }
 0x484   :  { %p575_p3 = scmp.ne.s32.totalorder %s749_s7, %s574_s20  ;;  %p578_p4 = scmp.lt.u32.totalorder %s574_s20, %s749_s7 }
 0x486   :  { %p580_p5 = pnand %p578_p4, %p575_p3 }
 0x488   :  { %583 = shalt.err (!%p580_p5)
}
 0x489   :  { %382 = dma.vmem_to_hbm [thread:$0]  %s380_s16, 128, %s749_s7, [#allocation4]  }
 0x48a   :  { %590 = dma.done.wait [#allocation4], 128  }
 0x48b   :  { %591 = vsyncadd [#allocation4], 4294967168 }
 0x48c   :  { %386 = vsyncpa [#allocation3], 1 }
 0x48d   :  { %387 = vsyncpa [#allocation6], 1 }
 0x48e   :  { %388 = vsyncpa [#allocation9], 1 }
 0x48f   :  { %389 = vsyncpa [#allocation4], 1 }

</bundles_post_ra>
